<compile_context>
chip_gen: v7x
topology: tpu7x:2x2x1
jax: 0.10.0
libtpu: 0.0.40
codegen_flags: <defaults>
</compile_context>

<pallas_src>
import functools
import math

import numpy as np

import jax
import jax.numpy as jnp
from jax.experimental import pallas as pl
from jax.experimental.pallas import tpu as pltpu


def _round_up(x, m):
    return ((x + m - 1) // m) * m


def _pick_tile(dim_al, desired, min_tile=128, max_waste=0.25):
    """Pick a lane-aligned tile <= desired; pad dim up to it with bounded waste."""
    t = min(desired, dim_al)
    while t > min_tile and (_round_up(dim_al, t) - dim_al) / dim_al > max_waste:
        t = max(t // 2, min_tile)
    return t, _round_up(dim_al, t)


# --------------------------------------------------------------------------
# Kernels
# --------------------------------------------------------------------------

def _fc_kernel_fused(x_ref, w_ref, *rest, w_lrmul, neg_slope, has_bias):
    """Whole K (and N tile) in one shot: no accumulator scratch needed.

    x_ref: (tm, K)  bf16      w_ref: (K, tn)  bf16
    [b_ref: (1, tn) f32]      o_ref: (tm, tn)
    """
    if has_bias:
        b_ref, o_ref = rest
    else:
        (o_ref,) = rest
    acc = jnp.dot(x_ref[...], w_ref[...],
                  preferred_element_type=jnp.float32) * w_lrmul
    if has_bias:
        acc = acc + b_ref[...]
    o_ref[...] = jnp.where(acc >= 0.0, acc, neg_slope * acc).astype(o_ref.dtype)


def _fc_kernel_ksplit(x_ref, w_ref, *rest, w_lrmul, neg_slope, has_bias):
    """General K-tiled path with a resident f32 accumulator.

    x_ref: (tm, tk) bf16      w_ref: (tk, tn) bf16
    [b_ref: (1, tn) f32]      o_ref: (tm, tn)    acc_ref: (tm, tn) f32 scratch
    """
    if has_bias:
        b_ref, o_ref, acc_ref = rest
    else:
        o_ref, acc_ref = rest

    k = pl.program_id(2)

    @pl.when(k == 0)
    def _():
        acc_ref[...] = jnp.zeros_like(acc_ref)

    acc_ref[...] += jnp.dot(x_ref[...], w_ref[...],
                            preferred_element_type=jnp.float32)

    @pl.when(k == pl.num_programs(2) - 1)
    def _():
        acc = acc_ref[...] * w_lrmul
        if has_bias:
            acc = acc + b_ref[...]
        o_ref[...] = jnp.where(acc >= 0.0, acc,
                               neg_slope * acc).astype(o_ref.dtype)


# --------------------------------------------------------------------------
# Parameter preparation (done ONCE, outside the forward path)
# --------------------------------------------------------------------------

def prepare_fc_params(weight, bias=None, *, w_lrmul=1.0, b_lrmul=1.0,
                      tn=512, tk=1024, param_dtype=jnp.bfloat16,
                      small_weight_bytes=4 * 1024 * 1024):
    """Transpose, cast and pad the static weight/bias once.

    weight: [out_ch, in_ch], bias: [out_ch] or None.
    Returns a dict consumed by fc_forward.
    """
    out_ch, in_ch = weight.shape
    K_al = _round_up(in_ch, 128)
    N_al = _round_up(out_ch, 128)
    itemsize = np.dtype(param_dtype).itemsize

    if K_al * N_al * itemsize <= small_weight_bytes and K_al <= 4096:
        # Small-weight fast path: whole weight VMEM-resident, no K/N grid axes.
        tk_sel, K_pad = K_al, K_al
        tn_sel, N_pad = N_al, N_al
    else:
        tk_sel, K_pad = _pick_tile(K_al, tk)
        tn_sel, N_pad = _pick_tile(N_al, tn)

    w_t = weight.T.astype(param_dtype)          # (in_ch, out_ch) -> lane-dense N
    if (in_ch, out_ch) != (K_pad, N_pad):
        w_p = jnp.zeros((K_pad, N_pad), param_dtype).at[:in_ch, :out_ch].set(w_t)
    else:
        w_p = w_t

    if bias is not None:
        b = bias.astype(jnp.float32) * jnp.float32(b_lrmul)
        b_p = jnp.zeros((1, N_pad), jnp.float32).at[0, :out_ch].set(b)
    else:
        b_p = None

    return dict(w=w_p, b=b_p, w_lrmul=float(w_lrmul),
                in_ch=in_ch, out_ch=out_ch,
                K_pad=K_pad, N_pad=N_pad, tk=tk_sel, tn=tn_sel,
                param_dtype=param_dtype)


# --------------------------------------------------------------------------
# Forward
# --------------------------------------------------------------------------

def fc_forward(x, params, *, tm=512, out_dtype=None):
    """x: [..., in_channels]; params: output of prepare_fc_params."""
    in_ch, out_ch = params["in_ch"], params["out_ch"]
    K_pad, N_pad = params["K_pad"], params["N_pad"]
    tk, tn = params["tk"], params["tn"]
    w_p, b_p = params["w"], params["b"]
    w_lrmul = params["w_lrmul"]
    pdt = params["param_dtype"]

    assert x.shape[-1] == in_ch
    lead = x.shape[:-1]
    M = math.prod(lead) if lead else 1
    x2d = x.reshape(M, in_ch)

    # tm: multiple of 16 (bf16 sublane packing), no bigger than needed.
    tm = max(16, min(tm, _round_up(M, 16)))
    M_pad = _round_up(M, tm)
    n_m = M_pad // tm
    n_n = N_pad // tn
    n_k = K_pad // tk

    # v7x megacore: make sure the parallel (i, j) grid has >= 2 blocks
    # whenever a legal split exists.
    if n_m * n_n < 2:
        if tn % 256 == 0:
            tn //= 2
            n_n = N_pad // tn
        elif tm % 32 == 0:
            tm //= 2
            n_m = M_pad // tm

    # Cast x to bf16 once; pad only when the shape actually requires it.
    if M == M_pad and in_ch == K_pad:
        x_p = x2d.astype(pdt)
    else:
        x_p = jnp.zeros((M_pad, K_pad), pdt).at[:M, :in_ch].set(x2d.astype(pdt))

    out_dtype = x.dtype if out_dtype is None else out_dtype
    has_bias = b_p is not None
    operands = [x_p, w_p] + ([b_p] if has_bias else [])

    out_bytes = M_pad * N_pad * np.dtype(out_dtype).itemsize
    bias_bytes = (b_p.size * b_p.dtype.itemsize) if has_bias else 0
    cost = pl.CostEstimate(
        flops=int(2 * M_pad * N_pad * K_pad),
        transcendentals=0,
        bytes_accessed=int(x_p.size * x_p.dtype.itemsize
                           + w_p.size * w_p.dtype.itemsize
                           + bias_bytes + out_bytes),
    )

    if n_k == 1:
        # Fused path: whole contraction per grid step; no accumulator scratch.
        kernel = functools.partial(_fc_kernel_fused, w_lrmul=w_lrmul,
                                   neg_slope=0.2, has_bias=has_bias)
        grid = (n_m, n_n)
        in_specs = [
            pl.BlockSpec((tm, K_pad), lambda i, j: (i, 0)),   # x row tile
            pl.BlockSpec((K_pad, tn), lambda i, j: (0, j)),   # weight (K, tn)
        ]
        if has_bias:
            in_specs.append(pl.BlockSpec((1, tn), lambda i, j: (0, j)))
        out_specs = pl.BlockSpec((tm, tn), lambda i, j: (i, j))
        scratch = []
        dims = ("parallel", "parallel")
    else:
        kernel = functools.partial(_fc_kernel_ksplit, w_lrmul=w_lrmul,
                                   neg_slope=0.2, has_bias=has_bias)
        grid = (n_m, n_n, n_k)
        in_specs = [
            pl.BlockSpec((tm, tk), lambda i, j, k: (i, k)),   # x tile
            pl.BlockSpec((tk, tn), lambda i, j, k: (k, j)),   # weight tile (K, N)
        ]
        if has_bias:
            in_specs.append(pl.BlockSpec((1, tn), lambda i, j, k: (0, j)))
        out_specs = pl.BlockSpec((tm, tn), lambda i, j, k: (i, j))
        scratch = [pltpu.VMEM((tm, tn), jnp.float32)]
        dims = ("parallel", "parallel", "arbitrary")

    out_p = pl.pallas_call(
        kernel,
        out_shape=jax.ShapeDtypeStruct((M_pad, N_pad), out_dtype),
        grid_spec=pltpu.PrefetchScalarGridSpec(
            num_scalar_prefetch=0,
            grid=grid,
            in_specs=in_specs,
            out_specs=out_specs,
            scratch_shapes=scratch,
        ),
        compiler_params=pltpu.CompilerParams(
            dimension_semantics=dims,
            vmem_limit_bytes=48 * 1024 * 1024,
        ),
        cost_estimate=cost,
    )(*operands)

    out2d = out_p[:M, :out_ch]
    return out2d.reshape(*lead, out_ch)


# --------------------------------------------------------------------------
# Parameter init mirroring FC.__init__, and a pure-JAX reference
# --------------------------------------------------------------------------

def make_fc_params(key, in_channels, out_channels, gain=2 ** 0.5,
                   use_wscale=False, lrmul=1.0, bias=True):
    he_std = gain * in_channels ** (-0.5)
    if use_wscale:
        init_std = 1.0 / lrmul
        w_lrmul = he_std * lrmul
    else:
        init_std = he_std / lrmul
        w_lrmul = lrmul
    weight = jax.random.normal(
        key, (out_channels, in_channels), jnp.float32) * init_std
    if bias:
        b = jnp.zeros((out_channels,), jnp.float32)
        b_lrmul = lrmul
    else:
        b = None
        b_lrmul = 1.0
    return weight, b, w_lrmul, b_lrmul


def fc_reference(x, weight, bias, w_lrmul, b_lrmul, compute_dtype=jnp.bfloat16):
    """Reference with the same bf16 operand quantization as the kernel."""
    xq = x.astype(compute_dtype).astype(jnp.float32)
    wq = weight.astype(compute_dtype).astype(jnp.float32)
    out = jnp.einsum("...k,nk->...n", xq, wq) * w_lrmul
    if bias is not None:
        out = out + bias.astype(jnp.float32) * b_lrmul
    return jnp.where(out >= 0, out, 0.2 * out)


if __name__ == "__main__":
    key = jax.random.PRNGKey(0)
    k_w, k_x, k_w2, k_x2, k_b2 = jax.random.split(key, 5)

    # ---- Test 1: fused small-weight path, bias, use_wscale ----------------
    in_channels, out_channels = 32, 64
    # x: [batch, img, img, in_channels]  (F.linear acts on last dim)
    x = jax.random.normal(k_x, (2, 8, 8, in_channels), jnp.float32)
    weight, bias, w_lrmul, b_lrmul = make_fc_params(
        k_w, in_channels, out_channels, use_wscale=True, lrmul=1.0, bias=True)

    params = prepare_fc_params(weight, bias, w_lrmul=w_lrmul, b_lrmul=b_lrmul)
    out = jax.block_until_ready(fc_forward(x, params))
    ref = fc_reference(x, weight, bias, w_lrmul, b_lrmul)
    assert out.shape == (2, 8, 8, out_channels)
    assert jnp.allclose(out, ref, atol=2e-3, rtol=2e-3)

    # ---- Test 2: bias=False path ------------------------------------------
    w2, b2, wl2, bl2 = make_fc_params(
        k_w, in_channels, out_channels, use_wscale=False, lrmul=0.5, bias=False)
    params2 = prepare_fc_params(w2, None, w_lrmul=wl2, b_lrmul=bl2)
    out2 = jax.block_until_ready(fc_forward(x, params2))
    ref2 = fc_reference(x, w2, None, wl2, bl2)
    assert jnp.allclose(out2, ref2, atol=2e-3, rtol=2e-3)

    # ---- Test 3: force the general K-split kernel (small tiles) -----------
    in3, out3 = 384, 192
    x3 = jax.random.normal(k_x2, (4, in3), jnp.float32)
    w3, _, wl3, bl3 = make_fc_params(k_w2, in3, out3, use_wscale=True, bias=True)
    b3 = 0.1 * jax.random.normal(k_b2, (out3,), jnp.float32)
    params3 = prepare_fc_params(w3, b3, w_lrmul=wl3, b_lrmul=bl3,
                                tn=128, tk=128, small_weight_bytes=0)
    out3v = jax.block_until_ready(fc_forward(x3, params3))
    ref3 = fc_reference(x3, w3, b3, wl3, bl3)
    assert out3v.shape == (4, out3)
    assert jnp.allclose(out3v, ref3, atol=2e-3, rtol=2e-3)

    print("KERNEL_OK")
</pallas_src>

<mosaic_0001>
module attributes {stable_mosaic.version = 11 : i64} {
  func.func @_fc_kernel_fused(%arg0: i32, %arg1: i32, %arg2: memref<64x128xbf16, #tpu.memory_space<vmem>>, %arg3: memref<128x128xbf16, #tpu.memory_space<vmem>>, %arg4: memref<1x128xf32, #tpu.memory_space<vmem>>, %arg5: memref<64x128xf32, #tpu.memory_space<vmem>>) attributes {dimension_semantics = [#tpu.dimension_semantics<parallel>, #tpu.dimension_semantics<parallel>], iteration_bounds = array<i64: 2, 1>, scalar_prefetch = 0 : i64, scratch_operands = 0 : i64, tpu.core_type = #tpu.core_type<tc>, window_params = [{transform_indices = @transform_0, window_bounds = array<i64: 64, 128>}, {transform_indices = @transform_1, window_bounds = array<i64: 128, 128>}, {transform_indices = @transform_2, window_bounds = array<i64: 1, 128>}, {transform_indices = @transform_3, window_bounds = array<i64: 64, 128>}]} {
    %c0 = arith.constant 0 : index
    %c0_0 = arith.constant 0 : index
    %0 = vector.load %arg2[%c0, %c0_0] : memref<64x128xbf16, #tpu.memory_space<vmem>>, vector<64x128xbf16>
    %c0_1 = arith.constant 0 : index
    %c0_2 = arith.constant 0 : index
    %1 = vector.load %arg3[%c0_1, %c0_2] : memref<128x128xbf16, #tpu.memory_space<vmem>>, vector<128x128xbf16>
    %cst = arith.constant dense<0.000000e+00> : vector<64x128xf32>
    %2 = tpu.matmul %0, %1, %cst {dimension_numbers = #tpu.dot_dimension_numbers<[1], [0], [0], [1], [0, 0, 1, 1], [], []>} : vector<64x128xbf16>, vector<128x128xbf16>, vector<64x128xf32> -> vector<64x128xf32>
    %cst_3 = arith.constant 2.500000e-01 : f32
    %3 = vector.broadcast %cst_3 : f32 to vector<64x128xf32>
    %4 = arith.mulf %2, %3 : vector<64x128xf32>
    %c0_4 = arith.constant 0 : index
    %c0_5 = arith.constant 0 : index
    %5 = vector.load %arg4[%c0_4, %c0_5] : memref<1x128xf32, #tpu.memory_space<vmem>>, vector<1x128xf32>
    %6 = vector.broadcast %5 : vector<1x128xf32> to vector<64x128xf32>
    %7 = arith.addf %4, %6 : vector<64x128xf32>
    %cst_6 = arith.constant 0.000000e+00 : f32
    %8 = vector.broadcast %cst_6 : f32 to vector<64x128xf32>
    %9 = arith.cmpf oge, %7, %8 : vector<64x128xf32>
    %cst_7 = arith.constant 2.000000e-01 : f32
    %10 = vector.broadcast %cst_7 : f32 to vector<64x128xf32>
    %11 = arith.mulf %10, %7 : vector<64x128xf32>
    %12 = arith.select %9, %7, %11 : vector<64x128xi1>, vector<64x128xf32>
    %c0_8 = arith.constant 0 : index
    %c0_9 = arith.constant 0 : index
    %13 = vector.load %arg5[%c0_8, %c0_9] : memref<64x128xf32, #tpu.memory_space<vmem>>, vector<64x128xf32>
    tpu.vector_store %arg5[%c0_8, %c0_9], %12 {strides = array<i32>} : memref<64x128xf32, #tpu.memory_space<vmem>>, vector<64x128xf32>,
    return
  }
  func.func @transform_0(%arg0: i32, %arg1: i32) -> (i32, i32) {
    %c0_i32 = arith.constant 0 : i32
    %c0_i32_0 = arith.constant 0 : i32
    return %arg0, %c0_i32 : i32, i32
  }
  func.func @transform_1(%arg0: i32, %arg1: i32) -> (i32, i32) {
    %c0_i32 = arith.constant 0 : i32
    %c0_i32_0 = arith.constant 0 : i32
    return %c0_i32, %arg1 : i32, i32
  }
  func.func @transform_2(%arg0: i32, %arg1: i32) -> (i32, i32) {
    %c0_i32 = arith.constant 0 : i32
    %c0_i32_0 = arith.constant 0 : i32
    return %c0_i32, %arg1 : i32, i32
  }
  func.func @transform_3(%arg0: i32, %arg1: i32) -> (i32, i32) {
    %c0_i32 = arith.constant 0 : i32
    return %arg0, %arg1 : i32, i32
  }
}

</mosaic_0001>

<bundles_post_ra>
// kernel: tpu_custom_call.1
= control target key start
LH: loop header
LB: loop body
LE: loop exit
PB: predicated region body
PF: predicated region fallthrough
CT: control target
= control target key end

     0   :  { %8 = vsyncpa [#allocation3], 0  ;;  %s1164_s0 = inlined_call_operand.hbm [shape: bf16[128,128], index: 0, kind: input, shape index: {}]   ;;  %s1165_s1 = inlined_call_operand.hbm [shape: bf16[128,128], index: 1, kind: input, shape index: {}]   ;;  %s1166_s2 = inlined_call_operand.vmem [shape: f32[1,128], index: 2, kind: input, shape index: {}]   ;;  %s1167_s3 = inlined_call_operand.hbm [shape: f32[128,128], index: 3, kind: output, shape index: {}]  }
   0x1   :  { %10 = vsyncpa [#allocation3 + $0x1], 0 }
   0x2   :  { %11 = vsyncpa [#allocation6], 0 }
   0x3   :  { %12 = vsyncpa [#allocation4], 0 }
   0x4   :  { %14 = vsyncpa [#allocation4 + $0x1], 0  ;;  %s927_s12 = smov 0   ;;  %s929_s13 = smov 0  }
   0x5   :  { %s931_s14 = smov 0   ;;  %s933_s15 = smov 0  }
   0x6   :  { %s935_s16 = smov 0   ;;  %s937_s17 = smov 0  }
   0x7 LB: > { %s580_s18 = sadd.s32 4294967295, %s898_s17   ;;  %s581_s19 = sadd.s32 4294967294, %s898_s17   ;;  %s898_s17 = sphi %s937_s17, %s20_s17   ;;  %s894_s16 = sphi %s935_s16, %s1191_s16   ;;  %s890_s15 = sphi %s933_s15, %s1190_s15   ;;  %s886_s14 = sphi %s931_s14, %s1189_s14   ;;  %s882_s13 = sphi %s929_s13, %s1188_s13   ;;  %s878_s12 = sphi %s927_s12, %s1187_s12  }
   0x8   : > { %p52_p0 = scmp.ne.s32.totalorder %s882_s13, %s878_s12  ;;  %p961_p1 = scmp.eq.s32.totalorder %s580_s18, 0 }
   0x9   : > { %p965_p2 = scmp.eq.s32.totalorder %s580_s18, 1  ;;  %p136_p3 = scmp.eq.s32.totalorder %s581_s19, 1 }
   0xa   : > { %s1172_s20 = scalar_select %p961_p1, 1, 0 }
   0xb   : > { %s1173_s21 = scalar_select %p965_p2, 1, 0 }
   0xc   : > { %p971_p4 = por %p961_p1, %p52_p0  ;;  %p582_p5 = scmp.ge.s32.totalorder %s898_s17, 1 }
   0xd   : > { %p976_p6 = por %p136_p3, %p52_p0  ;;  %p143_p7 = scmp.lt.s32.totalorder %s898_s17, 3 }
   0xe   : > { %s1174_s22 = scalar_select %p971_p4, 1, 0 }
   0xf   : > { %s1175_s23 = scalar_select %p976_p6, 1, 0 }
  0x10   : > { %p981_p8 = pnand %p582_p5, %p143_p7  ;;  %s900_s25 = smov [#allocation5]  }
  0x11   : > { %s157_s26 = sshll.u32 %s900_s25, 4  ;;  %s32_s28 = sadd.s32 1, %s894_s16  ;;  %s158_s26 = int_to_ptr.vmem [resolvable:$true] %s157_s26 }
  0x12   : > { %s1176_s24 = scalar_select %p981_p8, 1, 0 }
  0x13   : > { %p673_p9 = pneg %p981_p8  ;;  %s754_s4 = scalar_lea.hbm %s1165_s1, 1024 }
  0x14   : > { %p755_p12 = scmp.ne.s32.totalorder %s1165_s1, %s754_s4  ;;  %p761_p5 = scmp.lt.u32.totalorder %s754_s4, %s1165_s1 }
  0x15   : > { %p990_p11 = pnand %p673_p9, %p961_p1 }
  0x17   : > { %p756_p13 = pneg %p990_p11 }
  0x19   : > { %p757_p0 = pnand %p756_p13, %p755_p12 }
  0x1b   : > { %p758_p3 = pneg %p757_p0 }
  0x1d   : > { %p763_p7 = pnand %p761_p5, %p758_p3 }
  0x1f   : > { %766 = shalt.err (!%p763_p7)
}
  0x20   : > { %s767_s9 = scalar_lea.vmem %s158_s26, 1024  ;;  %p775_p1 = scmp.lt.s32.totalorder %s158_s26, %s158_s26 }
  0x21   : > { %p768_p9 = scmp.ne.s32.totalorder %s158_s26, %s767_s9  ;;  %p776_p4 = scmp.lt.s32.totalorder %s767_s9, %s767_s9 }
  0x23   : > { %p770_p10 = pnand %p768_p9, %p756_p13  ;;  %p777_p8 = por %p776_p4, %p775_p1 }
  0x25   : > { %p771_p6 = pneg %p770_p10 }
  0x27   : > { %p778_p2 = pnand %p777_p8, %p771_p6 }
  0x29   : > { %781 = shalt.err (!%p778_p2)
}
  0x2a   : > { %s901_s10 = smov 64   ;;  %s902_s11 = smov 4  }
  0x2b   : > { %676 = dma.hbm_to_vmem [thread:$0]  (!%p990_p11), %s1165_s1, 1024, %s158_s26, [#allocation6], %s901_s10, %s901_s10, %s902_s11  }
  0x2c   : > { %p34_p1 = scmp.ge.s32.totalorder %s32_s28, 2  ;;  %s39_s25 = sadd.s32 1, %s886_s14 }
  0x2d   : > { %p46_p2 = scmp.ne.s32.totalorder %s886_s14, %s882_s13  ;;  %p47_p4 = scmp.eq.s32.totalorder %s898_s17, 0 }
  0x2e   : > { %s1193_s28 = smov (%p34_p1, %s32_s28), 0  ;;  %p1179_p8 = scmp.ne.s32.totalorder %s1173_s21, 0 }
  0x2f   : > { %p1020_p6 = por %p47_p4, %p46_p2  ;;  %s36_s30 = ssub.s32 %s894_s16, %s1193_s28 }
  0x30   : > { %p1026_p10 = por %p1179_p8, %p46_p2  ;;  %p686_p12 = scmp.lt.s32.totalorder %s898_s17, 2 }
  0x31   : > { %p37_p11 = scmp.eq.s32.totalorder %s36_s30, 0  ;;  %s177_s26 = sand.u32 1, %s886_s14  }
  0x32   : > { %s586_s4 = sshll.u32 %s177_s26, 5  ;;  %s611_s6 = sshll.u32 %s894_s16, 9 }
  0x33   : > { %s1035_s5 = scalar_select %p37_p11, %s886_s14, %s39_s25  }
  0x34   : > { %s1041_s9 = scalar_lea.hbm %s1164_s0, %s611_s6  ;;  %s181_s21 = scalar_lea.vmem [#allocation2], %s586_s4 }
  0x35   : > { %s188_s18 = sshll.u32 %s181_s21, 4  ;;  %p1047_p13 = pnand %p686_p12, %p1020_p6  ;;  %s1043_s18 = int_to_ptr.vmem [resolvable:$true] %s188_s18 }
  0x36   : > { %s1051_s25 = scalar_lea.sflag [#allocation3], %s177_s26  ;;  %s782_s30 = scalar_lea.hbm %s1041_s9, 512 }
  0x37   : > { %p783_p0 = scmp.ne.s32.totalorder %s1041_s9, %s782_s30  ;;  %p784_p3 = pneg %p1047_p13 }
  0x38   : > { %s787_s29 = scalar_lea.hbm %s1164_s0, 1024  ;;  %p788_p9 = scmp.lt.u32.totalorder %s1041_s9, %s1164_s0 }
  0x39   : > { %p785_p5 = pnand %p784_p3, %p783_p0  ;;  %p789_p1 = scmp.lt.u32.totalorder %s787_s29, %s782_s30 }
  0x3a   : > { %p791_p4 = scmp.lt.u32.totalorder %s782_s30, %s1041_s9 }
  0x3b   : > { %p786_p7 = pneg %p785_p5  ;;  %p790_p2 = por %p789_p1, %p788_p9 }
  0x3d   : > { %p792_p6 = por %p791_p4, %p790_p2 }
  0x3f   : > { %p793_p8 = pnand %p792_p6, %p786_p7 }
  0x41   : > { %796 = shalt.err (!%p793_p8)
}
  0x42   : > { %s797_s26 = scalar_lea.vmem %s1043_s18, 512  ;;  %s903_s21 = smov [#allocation2]  }
  0x43   : > { %p798_p12 = scmp.ne.s32.totalorder %s1043_s18, %s797_s26  ;;  %s802_s4 = sshll.u32 %s903_s21, 4  ;;  %s803_s4 = int_to_ptr.vmem [resolvable:$false] %s802_s4 }
  0x44   : > { %s804_s6 = scalar_lea.vmem %s803_s4, 1024  ;;  %p805_p5 = scmp.lt.s32.totalorder %s1043_s18, %s803_s4 }
  0x45   : > { %p800_p11 = pnand %p798_p12, %p784_p3  ;;  %p806_p9 = scmp.lt.s32.totalorder %s804_s6, %s797_s26 }
  0x47   : > { %p801_p0 = pneg %p800_p11  ;;  %p807_p1 = por %p806_p9, %p805_p5 }
  0x49   : > { %p808_p2 = pnand %p807_p1, %p801_p0 }
  0x4b   : > { %811 = shalt.err (!%p808_p2)
}
  0x4c   : > { %680 = dma.hbm_to_vmem [thread:$0]  (!%p1047_p13), %s1041_s9, 512, %s1043_s18, %s1051_s25, %s901_s10, %s901_s10, %s902_s11  }
  0x4d   : > { %p1182_p3 = scmp.ne.s32.totalorder %s1176_s24, 0 }
  0x4e   : > { %s1085_s30 = sand.u32 (!%p1182_p3), 1, %s882_s13   ;;  %p1183_p7 = scmp.ne.s32.totalorder (!%p1182_p3), %s1174_s22, 0 }
  0x4f   : > { %200 = sbr.rel (%p1182_p3) target bundleno = 363 (0x16b), region = 32  ;;  %s590_s29 = sshll.u32 (!%p1182_p3), %s1085_s30, 5 }
  0x50   : > { %s203_s7 = scalar_lea.sflag (!%p1182_p3), [#allocation3], %s1085_s30  ;;  %s1089_s8 = scalar_lea.vmem (!%p1182_p3), [#allocation2], %s590_s29 }
  0x56   : > { %865 = dma.done.wait (%p1183_p7), %s203_s7, 512  }
  0x57   : > { %867 = vsyncadd (%p1183_p7), %s203_s7, 4294966784  ;;  %p1184_p13 = scmp.ne.s32.totalorder %s1172_s20, 0 }
  0x59   : > { %869 = dma.done.wait (%p1184_p13), [#allocation6], 1024  }
  0x5a   : > { %871 = vsyncadd (%p1184_p13), [#allocation6], 4294966272  ;;  %v742_v0 = vld [vmem:[#allocation5] sm:$0xff]   ;;  %v743_v1 = vld [vmem:[#allocation5 + $0x8] sm:$0xff]   ;;  %s592_s24 = sshll.u32 %s1085_s30, 6  ;;  %s612_s10 = sshll.u32 %s890_s15, 10 }
  0x5b   : > { %625 = vmatprep.subr.bf16.mxu0 %v742_v0  ;;  %649 = vmatprep.subr.bf16.mxu1 %v742_v0  ;;  %v744_v2 = vld [vmem:[#allocation5 + $0x10] sm:$0xff]   ;;  %v745_v3 = vld [vmem:[#allocation5 + $0x18] sm:$0xff]   ;;  %v750_v4 = vld [vmem:[%s1089_s8] sm:$0xff]   ;;  %s235_s11 = scalar_lea.vmem [#allocation7], %s592_s24  ;;  %s1113_s19 = scalar_lea.hbm %s1167_s3, %s612_s10 }
  0x5c   : > { %626 = vmatpush3.bf16.msra.mxu0 %v742_v0  ;;  %657 = vmatpush3.bf16.msra.mxu1 %v742_v0  ;;  %v751_v5 = vld [vmem:[%s1089_s8 + $0x10] sm:$0xff]   ;;  %v746_v6 = vld [vmem:[#allocation5 + $0x20] sm:$0xff]   ;;  %v747_v7 = vld [vmem:[#allocation5 + $0x28] sm:$0xff]   ;;  %s473_s9 = sshll.u32 %s235_s11, 4  ;;  %s459_s25 = scalar_lea.sflag [#allocation4], %s1085_s30  ;;  %s1115_s9 = int_to_ptr.vmem [resolvable:$true] %s473_s9 }
  0x5d   : > { %627 = vmatprep.subr.bf16.mxu0 %v743_v1  ;;  %650 = vmatprep.subr.bf16.mxu1 %v743_v1  ;;  %v748_v8 = vld [vmem:[#allocation5 + $0x30] sm:$0xff]   ;;  %v749_v9 = vld [vmem:[#allocation5 + $0x38] sm:$0xff]   ;;  %v752_v10 = vld [vmem:[%s1089_s8 + $0x8] sm:$0xff]   ;;  %s812_s26 = scalar_lea.vmem %s1115_s9, 1024  ;;  %s904_s21 = smov [#allocation7]  }
  0x5e   : > { %641 = vmatprep.mubr.bf16.mxu0 %v750_v4  ;;  %645 = vmatprep.mubr.bf16.mxu1 %v751_v5  ;;  %v753_v11 = vld [vmem:[%s1089_s8 + $0x18] sm:$0xff]   ;;  %v605_v13 = vld [vmem:[%s1166_s2] ss:$0 sm:$0xff]  ;;  %p813_p4 = scmp.ne.s32.totalorder %s1115_s9, %s812_s26  ;;  %s816_s4 = sshll.u32 %s904_s21, 4  ;;  %s817_s4 = int_to_ptr.vmem [resolvable:$false] %s816_s4 }
  0x5f   : > { %s818_s6 = scalar_lea.vmem %s817_s4, 2048  ;;  %p819_p12 = scmp.lt.s32.totalorder %s1115_s9, %s817_s4 }
  0x60   : > { %628 = vmatpush3.bf16.msra.mxu0 %v743_v1  ;;  %658 = vmatpush3.bf16.msra.mxu1 %v743_v1  ;;  %p814_p6 = pnand %p813_p4, %p1026_p10  ;;  %p820_p11 = scmp.lt.s32.totalorder %s818_s6, %s812_s26 }
  0x61   : > { %629 = vmatprep.subr.bf16.mxu0 %v744_v2  ;;  %651 = vmatprep.subr.bf16.mxu1 %v744_v2 }
  0x62   : > { %p815_p8 = pneg %p814_p6  ;;  %p821_p0 = por %p820_p11, %p819_p12 }
  0x64   : > { %630 = vmatpush3.bf16.msra.mxu0 %v744_v2  ;;  %659 = vmatpush3.bf16.msra.mxu1 %v744_v2  ;;  %p822_p5 = pnand %p821_p0, %p815_p8 }
  0x65   : > { %631 = vmatprep.subr.bf16.mxu0 %v745_v3  ;;  %652 = vmatprep.subr.bf16.mxu1 %v745_v3 }
  0x68   : > { %632 = vmatpush3.bf16.msra.mxu0 %v745_v3  ;;  %660 = vmatpush3.bf16.msra.mxu1 %v745_v3 }
  0x69   : > { %633 = vmatprep.subr.bf16.mxu0 %v746_v6  ;;  %653 = vmatprep.subr.bf16.mxu1 %v746_v6 }
  0x6c   : > { %634 = vmatpush3.bf16.msra.mxu0 %v746_v6  ;;  %661 = vmatpush3.bf16.msra.mxu1 %v746_v6 }
  0x6d   : > { %635 = vmatprep.subr.bf16.mxu0 %v747_v7  ;;  %654 = vmatprep.subr.bf16.mxu1 %v747_v7 }
  0x70   : > { %636 = vmatpush3.bf16.msra.mxu0 %v747_v7  ;;  %662 = vmatpush3.bf16.msra.mxu1 %v747_v7 }
  0x71   : > { %637 = vmatprep.subr.bf16.mxu0 %v748_v8  ;;  %655 = vmatprep.subr.bf16.mxu1 %v748_v8 }
  0x74   : > { %638 = vmatpush3.bf16.msra.mxu0 %v748_v8  ;;  %663 = vmatpush3.bf16.msra.mxu1 %v748_v8 }
  0x75   : > { %639 = vmatprep.subr.bf16.mxu0 %v749_v9  ;;  %656 = vmatprep.subr.bf16.mxu1 %v749_v9 }
  0x78   : > { %640 = vmatpush3.bf16.msra.mxu0 %v749_v9  ;;  %664 = vmatpush3.bf16.msra.mxu1 %v749_v9 }
  0x7b   : > { %642 = vmatmul.mubr.bf16.vlgmr.msra.gmra.mrb[0].mxu0 %v752_v10  ;;  %646 = vmatmul.mubr.bf16.vlgmr.msra.gmra.mrb[0].mxu1 %v753_v11 }
 0x14e   : > { %v643_v12 = vpop.f32.mrb[0].mxu0  ;;  %v647_v14 = vpop.f32.mrb[0].mxu1 }
 0x14f   : > { %v405_v15 = vmul.f32 0.25, %v643_v12  ;;  %v409_v16 = vmul.f32 0.25, %v647_v14  ;;  %v372_v17 = vpop.f32.mrb[1].mxu0  ;;  %v388_v18 = vpop.f32.mrb[1].mxu1 }
 0x150   : > { %v403_v19 = vmul.f32 0.25, %v372_v17  ;;  %v407_v20 = vmul.f32 0.25, %v388_v18  ;;  %v644_v21 = vpop.f32.mrb[2].mxu0  ;;  %v648_v22 = vpop.f32.mrb[2].mxu1 }
 0x151   : > { %v420_v23 = vadd.f32 %v605_v13, %v405_v15  ;;  %v424_v24 = vadd.f32 %v605_v13, %v409_v16  ;;  %v406_v25 = vmul.f32 0.25, %v644_v21  ;;  %v410_v26 = vmul.f32 0.25, %v648_v22  ;;  %v375_v27 = vpop.f32.mrb[3].mxu0  ;;  %v391_v28 = vpop.f32.mrb[3].mxu1 }
 0x152   : > { %v418_v29 = vadd.f32 %v605_v13, %v403_v19  ;;  %v422_v30 = vadd.f32 %v605_v13, %v407_v20  ;;  %v404_v31 = vmul.f32 0.25, %v375_v27  ;;  %v408_v32 = vmul.f32 0.25, %v391_v28 }
 0x153   : > { %vm428_vm0 = vcmp.ge.f32.partialorder %v420_v23, 0.0  ;;  %v436_v33 = vmul.f32 0.2, %v420_v23  ;;  %vm432_vm1 = vcmp.ge.f32.partialorder %v424_v24, 0.0  ;;  %v440_v34 = vmul.f32 0.2, %v424_v24 }
 0x154   : > { %vm426_vm2 = vcmp.ge.f32.partialorder %v418_v29, 0.0  ;;  %v434_v35 = vmul.f32 0.2, %v418_v29  ;;  %vm430_vm3 = vcmp.ge.f32.partialorder %v422_v30, 0.0  ;;  %v438_v36 = vmul.f32 0.2, %v422_v30 }
 0x155   : > { %v444_v37 = vsel %vm428_vm0, %v420_v23, %v436_v33  ;;  %v448_v38 = vsel %vm432_vm1, %v424_v24, %v440_v34  ;;  %v421_v39 = vadd.f32 %v605_v13, %v406_v25  ;;  %v425_v40 = vadd.f32 %v605_v13, %v410_v26 }
 0x156   : > { %452 = vst [vmem:[%s235_s11 + $0x10] sm:$0xff] %v444_v37  ;;  %456 = vst [vmem:[%s235_s11 + $0x30] sm:$0xff] %v448_v38  ;;  %v442_v41 = vsel %vm426_vm2, %v418_v29, %v434_v35  ;;  %v446_v42 = vsel %vm430_vm3, %v422_v30, %v438_v36  ;;  %v419_v43 = vadd.f32 %v605_v13, %v404_v31 }
 0x157   : > { %v423_v44 = vadd.f32 %v605_v13, %v408_v32  ;;  %450 = vst [vmem:[%s235_s11] sm:$0xff] %v442_v41  ;;  %454 = vst [vmem:[%s235_s11 + $0x20] sm:$0xff] %v446_v42  ;;  %vm429_vm4 = vcmp.ge.f32.partialorder %v421_v39, 0.0  ;;  %v437_v45 = vmul.f32 0.2, %v421_v39  ;;  %vm433_vm5 = vcmp.ge.f32.partialorder %v425_v40, 0.0 }
 0x158   : > { %v441_v46 = vmul.f32 0.2, %v425_v40  ;;  %vm427_vm6 = vcmp.ge.f32.partialorder %v419_v43, 0.0  ;;  %v435_v47 = vmul.f32 0.2, %v419_v43 }
 0x159   : > { %vm431_vm7 = vcmp.ge.f32.partialorder %v423_v44, 0.0  ;;  %v439_v48 = vmul.f32 0.2, %v423_v44  ;;  %v445_v49 = vsel %vm429_vm4, %v421_v39, %v437_v45 }
 0x15a   : > { %v449_v50 = vsel %vm433_vm5, %v425_v40, %v441_v46  ;;  %453 = vst [vmem:[%s235_s11 + $0x18] sm:$0xff] %v445_v49  ;;  %v443_v51 = vsel %vm427_vm6, %v419_v43, %v435_v47 }
 0x15b   : > { %457 = vst [vmem:[%s235_s11 + $0x38] sm:$0xff] %v449_v50  ;;  %v447_v52 = vsel %vm431_vm7, %v423_v44, %v439_v48  ;;  %451 = vst [vmem:[%s235_s11 + $0x8] sm:$0xff] %v443_v51 }
 0x15c   : > { %455 = vst [vmem:[%s235_s11 + $0x28] sm:$0xff] %v447_v52 }
 0x15d   : > { %825 = shalt.err (!%p822_p5)
}
 0x15e   : > { %s826_s29 = scalar_lea.hbm %s1113_s19, 1024  ;;  %s830_s20 = scalar_lea.hbm %s1167_s3, 2048 }
 0x15f   : > { %p827_p9 = scmp.ne.s32.totalorder %s1113_s19, %s826_s29  ;;  %p831_p3 = scmp.lt.u32.totalorder %s1113_s19, %s1167_s3 }
 0x160   : > { %p832_p7 = scmp.lt.u32.totalorder %s830_s20, %s826_s29  ;;  %p834_p4 = scmp.lt.u32.totalorder %s826_s29, %s1113_s19 }
 0x161   : > { %p828_p1 = pnand %p827_p9, %p1026_p10 }
 0x162   : > { %p833_p13 = por %p832_p7, %p831_p3 }
 0x163   : > { %p829_p2 = pneg %p828_p1 }
 0x164   : > { %p835_p6 = por %p834_p4, %p833_p13 }
 0x166   : > { %p836_p8 = pnand %p835_p6, %p829_p2 }
 0x168   : > { %839 = shalt.err (!%p836_p8)
}
 0x169   : > { %s905_s10 = smov 128   ;;  %s906_s11 = smov 8  }
 0x16a   : > { %671 = dma.vmem_to_hbm [thread:$0]  (%p1026_p10), %s1115_s9, 1024, %s1113_s19, %s459_s25, %s905_s10, %s905_s10, %s906_s11  }
 0x16b PF: > { %s488_s15 = sand.u32 1, %s878_s12   ;;  %p1185_p12 = scmp.ne.s32.totalorder %s1175_s23, 0 }
 0x16c   : > { %p1186_p11 = scmp.ge.s32.totalorder %s898_s17, 2  ;;  %s489_s18 = scalar_lea.sflag [#allocation4], %s488_s15 }
 0x16e   : > { %p682_p0 = pnand %p1186_p11, %p1185_p12 }
 0x170   : > { %873 = dma.done.wait (!%p682_p0), %s489_s18, 1024  }
 0x171   : > { %875 = vsyncadd (!%p682_p0), %s489_s18, 4294966272  ;;  %s20_s17 = sadd.s32 1, %s898_s17   ;;  %s1187_s12 = smov %s882_s13 }
 0x172   : > { %p17_p5 = scmp.ge.s32.totalorder %s20_s17, 4   ;;  %s1188_s13 = smov %s886_s14 }
 0x173   : > { %s1189_s14 = smov %s1035_s5  ;;  %s1190_s15 = smov %s894_s16 }
 0x174   : > { %s1191_s16 = smov %s1193_s28  ;;  %19 = sbr.rel (!%p17_p5) target bundleno = 7 (0x7), region = 85 }
 0x17b   :  { %494 = vsyncpa [#allocation3], 1 }
 0x17c   :  { %496 = vsyncpa [#allocation3 + $0x1], 1 }
 0x17d   :  { %497 = vsyncpa [#allocation6], 1 }
 0x17e   :  { %498 = vsyncpa [#allocation4], 1 }
 0x17f   :  { %500 = vsyncpa [#allocation4 + $0x1], 1 }

</bundles_post_ra>
